<compile_context>
chip_gen: v7x
topology: tpu7x:2x2x1
jax: 0.10.0
libtpu: 0.0.40
codegen_flags: <defaults>
</compile_context>

<pallas_src>
import jax
import jax.numpy as jnp
from jax.experimental import pallas as pl
from jax.experimental.pallas import tpu as pltpu


# ----------------------------------------------------------------------------
# Fused MLP kernel: x -> sigmoid(x@W0+b0) -> ... -> sigmoid(.) -> (.)@WL+bL
# refs = (w0, b0, w1, b1, ..., wL, bL, o_ref). The layer count is fixed at trace
# time, so the Python loop simply unrolls into chained MXU matmuls in VMEM.
# ----------------------------------------------------------------------------
def _fused_mlp_kernel(x_ref, *refs):
    o_ref = refs[-1]
    wb = refs[:-1]
    n_layers = len(wb) // 2
    h = x_ref[...].astype(jnp.float32)
    for li in range(n_layers):
        w = wb[2 * li][...]            # (in_dim, out_dim)
        b = wb[2 * li + 1][...]        # (1, out_dim) -- broadcast hoisted, once/layer
        z = jnp.dot(h, w, preferred_element_type=jnp.float32) + b
        h = jax.nn.sigmoid(z) if li < n_layers - 1 else z
    o_ref[...] = h.astype(o_ref.dtype)


# ----------------------------------------------------------------------------
# Wrapper: one pallas_call for the whole network.
#   bs <= batch_tile : grid-less call, everything in VMEM.
#   bs  > batch_tile : pad batch to a multiple of batch_tile and grid over batch
#                      tiles with "parallel" semantics; weights resident.
# ----------------------------------------------------------------------------
def matrixnet_forward(x, params, dq_dim, control_dim, *, batch_tile=128):
    bs, in_dim = x.shape
    out_dim = params[-1][0].shape[1]
    assert out_dim == dq_dim * control_dim

    flat = []
    for w, b in params:
        flat.append(jnp.asarray(w, jnp.float32))
        flat.append(jnp.asarray(b, jnp.float32).reshape(1, -1))
    n_in = 1 + len(flat)

    if bs <= batch_tile:
        z = pl.pallas_call(
            _fused_mlp_kernel,
            out_shape=jax.ShapeDtypeStruct((bs, out_dim), jnp.float32),
            in_specs=[pl.BlockSpec(memory_space=pltpu.MemorySpace.VMEM)] * n_in,
            out_specs=pl.BlockSpec(memory_space=pltpu.MemorySpace.VMEM),
        )(x, *flat)
    else:
        n_tiles = pl.cdiv(bs, batch_tile)
        padded = n_tiles * batch_tile
        x_in = jnp.pad(x, ((0, padded - bs), (0, 0))) if padded != bs else x

        in_specs = [pl.BlockSpec((batch_tile, in_dim), lambda i: (i, 0))]
        for arr in flat:
            # constant index_map -> weights/biases stay resident across grid steps
            in_specs.append(pl.BlockSpec(arr.shape, lambda i: (0, 0)))

        z = pl.pallas_call(
            _fused_mlp_kernel,
            out_shape=jax.ShapeDtypeStruct((padded, out_dim), jnp.float32),
            grid=(n_tiles,),
            in_specs=in_specs,
            out_specs=pl.BlockSpec((batch_tile, out_dim), lambda i: (i, 0)),
            compiler_params=pltpu.CompilerParams(
                dimension_semantics=("parallel",)),
        )(x_in, *flat)
        z = z[:bs]

    return z.reshape(bs, dq_dim, control_dim)


# ----------------------------------------------------------------------------
# Deterministic parameter construction mirroring MatrixNet.__init__ shapes.
# Hidden layers: orthogonal weight init (gain); last layer: torch-default-style
# uniform. Weights stored transposed as (in_dim, out_dim) for the kernel.
# ----------------------------------------------------------------------------
def _orthogonal(key, out_dim, in_dim, gain):
    rows, cols = out_dim, in_dim
    a = jax.random.normal(key, (max(rows, cols), min(rows, cols)), jnp.float32)
    q, r = jnp.linalg.qr(a)
    q = q * jnp.sign(jnp.diagonal(r))       # deterministic sign, like torch
    if rows < cols:
        q = q.T
    return gain * q[:rows, :cols]           # (out_dim, in_dim)


def init_matrixnet_params(key, net_dims, control_dim, gain=1.0):
    dq_dim = net_dims[-1]
    params = []
    for i in range(len(net_dims) - 2):
        key, kw, kb = jax.random.split(key, 3)
        w_oi = _orthogonal(kw, net_dims[i + 1], net_dims[i], gain)
        bound = 1.0 / float(jnp.sqrt(jnp.float32(net_dims[i])))
        b = jax.random.uniform(kb, (net_dims[i + 1],), jnp.float32, -bound, bound)
        params.append((w_oi.T, b))          # store (in_dim, out_dim)
    key, kw, kb = jax.random.split(key, 3)
    last_out = dq_dim * control_dim
    bound = 1.0 / float(jnp.sqrt(jnp.float32(net_dims[-2])))
    w_oi = jax.random.uniform(kw, (last_out, net_dims[-2]), jnp.float32, -bound, bound)
    b = jax.random.uniform(kb, (last_out,), jnp.float32, -bound, bound)
    params.append((w_oi.T, b))
    return params


if __name__ == "__main__":
    # state dim -> hidden -> hidden -> dq dim
    net_dims = [16, 32, 32, 8]
    control_dim = 4
    dq_dim = net_dims[-1]

    key = jax.random.PRNGKey(0)
    key, kx, kx2 = jax.random.split(key, 3)
    params = init_matrixnet_params(key, net_dims, control_dim, gain=1.0)

    def reference(xv):
        h = xv
        for (w, b) in params[:-1]:
            h = jax.nn.sigmoid(h @ w + b)
        z = h @ params[-1][0] + params[-1][1]
        return z.reshape(xv.shape[0], dq_dim, control_dim)

    # ---- small batch: single grid-less fused kernel ----
    bs = 8
    x = jax.random.normal(kx, (bs, net_dims[0]), jnp.float32)
    G = jax.block_until_ready(matrixnet_forward(x, params, dq_dim, control_dim))
    assert G.shape == (bs, dq_dim, control_dim)
    assert jnp.allclose(G, reference(x), atol=1e-5, rtol=1e-5)

    # ---- larger batch: batch tiled into 128-row blocks, "parallel" grid axis ----
    bs_big = 200
    x_big = jax.random.normal(kx2, (bs_big, net_dims[0]), jnp.float32)
    G_big = jax.block_until_ready(
        matrixnet_forward(x_big, params, dq_dim, control_dim))
    assert G_big.shape == (bs_big, dq_dim, control_dim)
    assert jnp.allclose(G_big, reference(x_big), atol=1e-5, rtol=1e-5)

    print("KERNEL_OK")
</pallas_src>

<mosaic_0001>
module attributes {stable_mosaic.version = 11 : i64} {
  func.func @_fused_mlp_kernel(%arg0: memref<8x16xf32, #tpu.memory_space<vmem>>, %arg1: memref<16x32xf32, #tpu.memory_space<vmem>>, %arg2: memref<1x32xf32, #tpu.memory_space<vmem>>, %arg3: memref<32x32xf32, #tpu.memory_space<vmem>>, %arg4: memref<1x32xf32, #tpu.memory_space<vmem>>, %arg5: memref<32x32xf32, #tpu.memory_space<vmem>>, %arg6: memref<1x32xf32, #tpu.memory_space<vmem>>, %arg7: memref<8x32xf32, #tpu.memory_space<vmem>>) attributes {dimension_semantics = [], scalar_prefetch = 0 : i64, scratch_operands = 0 : i64, tpu.core_type = #tpu.core_type<tc>} {
    %c0 = arith.constant 0 : index
    %c0_0 = arith.constant 0 : index
    %0 = vector.load %arg0[%c0, %c0_0] : memref<8x16xf32, #tpu.memory_space<vmem>>, vector<8x16xf32>
    %c0_1 = arith.constant 0 : index
    %c0_2 = arith.constant 0 : index
    %1 = vector.load %arg1[%c0_1, %c0_2] : memref<16x32xf32, #tpu.memory_space<vmem>>, vector<16x32xf32>
    %c0_3 = arith.constant 0 : index
    %c0_4 = arith.constant 0 : index
    %2 = vector.load %arg2[%c0_3, %c0_4] : memref<1x32xf32, #tpu.memory_space<vmem>>, vector<1x32xf32>
    %cst = arith.constant dense<0.000000e+00> : vector<8x32xf32>
    %3 = tpu.matmul %0, %1, %cst {dimension_numbers = #tpu.dot_dimension_numbers<[1], [0], [0], [1], [0, 0, 1, 1], [], []>} : vector<8x16xf32>, vector<16x32xf32>, vector<8x32xf32> -> vector<8x32xf32>
    %4 = vector.broadcast %2 : vector<1x32xf32> to vector<8x32xf32>
    %5 = arith.addf %3, %4 : vector<8x32xf32>
    %6 = arith.negf %5 : vector<8x32xf32>
    %7 = math.exp %6 : vector<8x32xf32>
    %cst_5 = arith.constant 1.000000e+00 : f32
    %8 = vector.broadcast %cst_5 : f32 to vector<8x32xf32>
    %9 = arith.addf %8, %7 : vector<8x32xf32>
    %10 = arith.divf %8, %9 : vector<8x32xf32>
    %c0_6 = arith.constant 0 : index
    %c0_7 = arith.constant 0 : index
    %11 = vector.load %arg3[%c0_6, %c0_7] : memref<32x32xf32, #tpu.memory_space<vmem>>, vector<32x32xf32>
    %c0_8 = arith.constant 0 : index
    %c0_9 = arith.constant 0 : index
    %12 = vector.load %arg4[%c0_8, %c0_9] : memref<1x32xf32, #tpu.memory_space<vmem>>, vector<1x32xf32>
    %cst_10 = arith.constant dense<0.000000e+00> : vector<8x32xf32>
    %13 = tpu.matmul %10, %11, %cst_10 {dimension_numbers = #tpu.dot_dimension_numbers<[1], [0], [0], [1], [0, 0, 1, 1], [], []>} : vector<8x32xf32>, vector<32x32xf32>, vector<8x32xf32> -> vector<8x32xf32>
    %14 = vector.broadcast %12 : vector<1x32xf32> to vector<8x32xf32>
    %15 = arith.addf %13, %14 : vector<8x32xf32>
    %16 = arith.negf %15 : vector<8x32xf32>
    %17 = math.exp %16 : vector<8x32xf32>
    %cst_11 = arith.constant 1.000000e+00 : f32
    %18 = vector.broadcast %cst_11 : f32 to vector<8x32xf32>
    %19 = arith.addf %18, %17 : vector<8x32xf32>
    %20 = arith.divf %18, %19 : vector<8x32xf32>
    %c0_12 = arith.constant 0 : index
    %c0_13 = arith.constant 0 : index
    %21 = vector.load %arg5[%c0_12, %c0_13] : memref<32x32xf32, #tpu.memory_space<vmem>>, vector<32x32xf32>
    %c0_14 = arith.constant 0 : index
    %c0_15 = arith.constant 0 : index
    %22 = vector.load %arg6[%c0_14, %c0_15] : memref<1x32xf32, #tpu.memory_space<vmem>>, vector<1x32xf32>
    %cst_16 = arith.constant dense<0.000000e+00> : vector<8x32xf32>
    %23 = tpu.matmul %20, %21, %cst_16 {dimension_numbers = #tpu.dot_dimension_numbers<[1], [0], [0], [1], [0, 0, 1, 1], [], []>} : vector<8x32xf32>, vector<32x32xf32>, vector<8x32xf32> -> vector<8x32xf32>
    %24 = vector.broadcast %22 : vector<1x32xf32> to vector<8x32xf32>
    %25 = arith.addf %23, %24 : vector<8x32xf32>
    %c0_17 = arith.constant 0 : index
    %c0_18 = arith.constant 0 : index
    %26 = vector.load %arg7[%c0_17, %c0_18] : memref<8x32xf32, #tpu.memory_space<vmem>>, vector<8x32xf32>
    tpu.vector_store %arg7[%c0_17, %c0_18], %25 {strides = array<i32>} : memref<8x32xf32, #tpu.memory_space<vmem>>, vector<8x32xf32>,
    return
  }
}

</mosaic_0001>

<bundles_post_ra>
// kernel: tpu_custom_call.1
= control target key start
LH: loop header
LB: loop body
LE: loop exit
PB: predicated region body
PF: predicated region fallthrough
CT: control target
= control target key end

     0   :  { %12 = vsyncpa [#allocation3], 0  ;;  %s695_s0 = inlined_call_operand.hbm [shape: f32[8,16], index: 0, kind: input, shape index: {}]   ;;  %s696_s1 = inlined_call_operand.hbm [shape: f32[16,32], index: 1, kind: input, shape index: {}]   ;;  %s697_s2 = inlined_call_operand.vmem [shape: f32[1,32], index: 2, kind: input, shape index: {}]   ;;  %s698_s3 = inlined_call_operand.hbm [shape: f32[32,32], index: 3, kind: input, shape index: {}]   ;;  %s699_s4 = inlined_call_operand.vmem [shape: f32[1,32], index: 4, kind: input, shape index: {}]   ;;  %s700_s5 = inlined_call_operand.hbm [shape: f32[32,32], index: 5, kind: input, shape index: {}]   ;;  %s701_s6 = inlined_call_operand.vmem [shape: f32[1,32], index: 6, kind: input, shape index: {}]   ;;  %s702_s7 = inlined_call_operand.hbm [shape: f32[8,32], index: 7, kind: output, shape index: {}]  }
   0x1   :  { %13 = vsyncpa [#allocation6], 0 }
   0x2   :  { %14 = vsyncpa [#allocation9], 0 }
   0x3   :  { %15 = vsyncpa [#allocation4], 0  ;;  %s564_s24 = smov [#allocation5]   ;;  %s446_s28 = scalar_lea.hbm %s696_s1, 256 }
   0x4   :  { %s31_s25 = sshll.u32 %s564_s24, 4  ;;  %p447_p0 = scmp.ne.s32.totalorder %s696_s1, %s446_s28  ;;  %s32_s25 = int_to_ptr.vmem [resolvable:$true] %s31_s25 }
   0x5   :  { %p450_p1 = scmp.lt.u32.totalorder %s446_s28, %s696_s1 }
   0x7   :  { %p452_p2 = pnand %p450_p1, %p447_p0 }
   0x9   :  { %455 = shalt.err (!%p452_p2)
}
   0xa   :  { %s456_s10 = scalar_lea.vmem %s32_s25, 256  ;;  %p461_p4 = scmp.lt.s32.totalorder %s32_s25, %s32_s25 }
   0xb   :  { %p457_p3 = scmp.ne.s32.totalorder %s32_s25, %s456_s10  ;;  %p462_p5 = scmp.lt.s32.totalorder %s456_s10, %s456_s10 }
   0xd   :  { %p463_p6 = por %p462_p5, %p461_p4 }
   0xf   :  { %p464_p7 = pnand %p463_p6, %p457_p3 }
  0x11   :  { %467 = shalt.err (!%p464_p7)
}
  0x12   :  { %s565_s11 = smov 128   ;;  %s566_s12 = smov 8  }
  0x13   :  { %37 = dma.hbm_to_vmem [thread:$0]  %s696_s1, 256, %s32_s25, [#allocation6], %s565_s11, %s565_s11, %s566_s12  }
  0x14   :  { %s567_s15 = smov [#allocation2]   ;;  %s568_s17 = smov [#allocation7]  }
  0x15   :  { %s22_s16 = sshll.u32 %s567_s15, 4  ;;  %s45_s18 = sshll.u32 %s568_s17, 4  ;;  %s23_s16 = int_to_ptr.vmem [resolvable:$true] %s22_s16  ;;  %s46_s18 = int_to_ptr.vmem [resolvable:$true] %s45_s18 }
  0x16   :  { %s468_s21 = scalar_lea.hbm %s695_s0, 128 }
  0x17   :  { %p469_p8 = scmp.ne.s32.totalorder %s695_s0, %s468_s21  ;;  %p472_p9 = scmp.lt.u32.totalorder %s468_s21, %s695_s0 }
  0x19   :  { %p474_p10 = pnand %p472_p9, %p469_p8 }
  0x1b   :  { %477 = shalt.err (!%p474_p10)
}
  0x1c   :  { %s478_s1 = scalar_lea.vmem %s23_s16, 128  ;;  %p483_p12 = scmp.lt.s32.totalorder %s23_s16, %s23_s16 }
  0x1d   :  { %p479_p11 = scmp.ne.s32.totalorder %s23_s16, %s478_s1  ;;  %p484_p13 = scmp.lt.s32.totalorder %s478_s1, %s478_s1 }
  0x1f   :  { %p485_p0 = por %p484_p13, %p483_p12 }
  0x21   :  { %p486_p1 = pnand %p485_p0, %p479_p11 }
  0x23   :  { %489 = shalt.err (!%p486_p1)
}
  0x24   :  { %25 = dma.hbm_to_vmem [thread:$0]  %s695_s0, 128, %s23_s16, [#allocation3]  }
  0x25   :  { %s490_s30 = scalar_lea.hbm %s698_s3, 512 }
  0x26   :  { %p491_p2 = scmp.ne.s32.totalorder %s698_s3, %s490_s30  ;;  %p494_p3 = scmp.lt.u32.totalorder %s490_s30, %s698_s3 }
  0x28   :  { %p496_p4 = pnand %p494_p3, %p491_p2 }
  0x2a   :  { %499 = shalt.err (!%p496_p4)
}
  0x2b   :  { %s500_s14 = scalar_lea.vmem %s46_s18, 512  ;;  %p505_p6 = scmp.lt.s32.totalorder %s46_s18, %s46_s18 }
  0x2c   :  { %p501_p5 = scmp.ne.s32.totalorder %s46_s18, %s500_s14  ;;  %p506_p7 = scmp.lt.s32.totalorder %s500_s14, %s500_s14 }
  0x2e   :  { %p507_p8 = por %p506_p7, %p505_p6 }
  0x30   :  { %p508_p9 = pnand %p507_p8, %p501_p5 }
  0x32   :  { %511 = shalt.err (!%p508_p9)
}
  0x33   :  { %51 = dma.hbm_to_vmem [thread:$0]  %s698_s3, 512, %s46_s18, [#allocation6], %s565_s11, %s565_s11, %s566_s12  }
  0x34   :  { %s569_s16 = smov [#allocation8]   ;;  %s512_s21 = scalar_lea.hbm %s700_s5, 512 }
  0x35   :  { %s59_s17 = sshll.u32 %s569_s16, 4  ;;  %p513_p10 = scmp.ne.s32.totalorder %s700_s5, %s512_s21  ;;  %s60_s17 = int_to_ptr.vmem [resolvable:$true] %s59_s17 }
  0x36   :  { %p516_p11 = scmp.lt.u32.totalorder %s512_s21, %s700_s5 }
  0x38   :  { %p518_p12 = pnand %p516_p11, %p513_p10 }
  0x3a   :  { %521 = shalt.err (!%p518_p12)
}
  0x3b   :  { %s522_s1 = scalar_lea.vmem %s60_s17, 512  ;;  %p527_p0 = scmp.lt.s32.totalorder %s60_s17, %s60_s17 }
  0x3c   :  { %p523_p13 = scmp.ne.s32.totalorder %s60_s17, %s522_s1  ;;  %p528_p1 = scmp.lt.s32.totalorder %s522_s1, %s522_s1 }
  0x3e   :  { %p529_p2 = por %p528_p1, %p527_p0 }
  0x40   :  { %p530_p3 = pnand %p529_p2, %p523_p13 }
  0x42   :  { %533 = shalt.err (!%p530_p3)
}
  0x43   :  { %65 = dma.hbm_to_vmem [thread:$0]  %s700_s5, 512, %s60_s17, [#allocation9], %s565_s11, %s565_s11, %s566_s12  }
  0x44   :  { %556 = dma.done.wait [#allocation3], 128  }
  0x45   :  { %557 = vsyncadd [#allocation3], 4294967168 }
  0x46   :  { %558 = dma.done.wait [#allocation6], 768  }
  0x47   :  { %559 = vsyncadd [#allocation6], 4294966528 }
  0x48   :  { %560 = dma.done.wait [#allocation9], 512  }
  0x49   :  { %561 = vsyncadd [#allocation9], 4294966784  ;;  %v570_v0 = vmov 0.0|0.0   ;;  %vm571_vm0 = vmmov 0   ;;  %v572_v1 = vmov 0.0   ;;  %v81_v2 = vld [vmem:[#allocation5] sm:$0xff] }
  0x4a   :  { %413 = vmatprep.subr.bf16.mxu0 %v570_v0  ;;  %388 = vmatprep.mubr.msk.f32.mxu0 %vm571_vm0, %v572_v1  ;;  %v82_v3 = vld [vmem:[#allocation5 + $0x8] sm:$0xff]  ;;  %v80_v5 = vld [vmem:[#allocation2] sm:$0xff]  ;;  %vm90_vm1 = vcmask 130048   ;;  %v170_v6 = vld [vmem:[#allocation7] sm:$0xff]  ;;  %vm181_vm2 = vcmask 261120   ;;  %s573_s28 = smov [#allocation10]  }
  0x4b   :  { %416 = vmatprep.subr.bf16.mxu1 %v570_v0  ;;  %399 = vmatprep.mubr.msk.f32.mxu1 %vm571_vm0, %v572_v1  ;;  %v414_v4 = vpack.c.bf16 %v82_v3, %v81_v2  ;;  %v171_v7 = vld [vmem:[#allocation7 + $0x8] sm:$0xff]  ;;  %v172_v8 = vld [vmem:[#allocation7 + $0x10] sm:$0xff]  ;;  %v173_v10 = vld [vmem:[#allocation7 + $0x18] sm:$0xff]  ;;  %s352_s29 = sshll.u32 %s573_s28, 4  ;;  %s353_s29 = int_to_ptr.vmem [resolvable:$true] %s352_s29 }
  0x4c   :  { %v417_v9 = vpack.c.bf16 %v171_v7, %v170_v6  ;;  %v420_v11 = vpack.c.bf16 %v173_v10, %v172_v8  ;;  %v363_v12 = vld [vmem:[%s697_s2] ss:$0 sm:$0xff]  ;;  %v261_v20 = vld [vmem:[#allocation8] sm:$0xff]  ;;  %v263_v22 = vld [vmem:[#allocation8 + $0x10] sm:$0xff]  ;;  %p539_p5 = scmp.lt.s32.totalorder %s353_s29, %s353_s29 }
  0x4d   :  { %415 = vmatpush3.bf16.msra.mxu0 %v414_v4  ;;  %v262_v21 = vld [vmem:[#allocation8 + $0x8] sm:$0xff]  ;;  %v264_v24 = vld [vmem:[#allocation8 + $0x18] sm:$0xff] }
  0x4e   :  { %422 = vmatprep.subr.bf16.mxu0 %v570_v0  ;;  %418 = vmatpush3.bf16.msra.mxu1 %v417_v9  ;;  %v423_v23 = vpack.c.bf16 %v262_v21, %v261_v20  ;;  %v426_v25 = vpack.c.bf16 %v264_v24, %v263_v22  ;;  %v366_v26 = vld [vmem:[%s699_s4] ss:$0 sm:$0xff]  ;;  %s534_s4 = scalar_lea.vmem %s353_s29, 128 }
  0x4f   :  { %419 = vmatprep.subr.bf16.mxu1 %v570_v0  ;;  %v369_v34 = vld [vmem:[%s701_s6] ss:$0 sm:$0xff]  ;;  %p535_p4 = scmp.ne.s32.totalorder %s353_s29, %s534_s4  ;;  %p540_p6 = scmp.lt.s32.totalorder %s534_s4, %s534_s4 }
  0x50   :  { %389 = vmatmul.mubr.msk.f32.vlgmr.msra.gmra.mrb[0].mxu0 %vm90_vm1, %v80_v5 }
  0x51   :  { %410 = vmatprep.mubr.msk.f32.mxu0 %vm571_vm0, %v572_v1  ;;  %424 = vmatpush3.bf16.msra.mxu0 %v423_v23  ;;  %p541_p7 = por %p540_p6, %p539_p5 }
  0x52   :  { %421 = vmatpush3.bf16.msra.mxu1 %v420_v11  ;;  %425 = vmatprep.subr.bf16.mxu0 %v570_v0 }
  0x53   :  { %p542_p8 = pnand %p541_p7, %p535_p4 }
  0x55   :  { %427 = vmatpush3.bf16.msra.mxu0 %v426_v25 }
 0x123   :  { %v160_v13 = vpop.f32.mrb[0].mxu0 }
 0x124   :  { %v161_v14 = vadd.f32 %v363_v12, %v160_v13  ;;  %v390_v15 = vpop.f32.mrb[1].mxu0 }
 0x126   :  { %v365_v16 = vmul.f32 -1.442695, %v161_v14 }
 0x128   :  { %438 = vpow2.f32 %v365_v16 }
 0x132   :  { %v439_v17 = vpop.eup %438 }
 0x133   :  { %v167_v18 = vadd.f32 1.0, %v439_v17 }
 0x135   :  { %440 = vrcp.f32 %v167_v18 }
 0x13f   :  { %v441_v19 = vpop.eup %440 }
 0x140   :  { %400 = vmatmul.mubr.msk.f32.vlgmr.msra.gmra.mrb[0].mxu1 %vm181_vm2, %v441_v19 }
 0x213   :  { %v251_v27 = vpop.f32.mrb[0].mxu1 }
 0x214   :  { %v252_v28 = vadd.f32 %v366_v26, %v251_v27  ;;  %v401_v29 = vpop.f32.mrb[1].mxu1 }
 0x216   :  { %v368_v30 = vmul.f32 -1.442695, %v252_v28 }
 0x218   :  { %442 = vpow2.f32 %v368_v30 }
 0x222   :  { %v443_v31 = vpop.eup %442 }
 0x223   :  { %v258_v32 = vadd.f32 1.0, %v443_v31 }
 0x225   :  { %444 = vrcp.f32 %v258_v32 }
 0x22f   :  { %v445_v33 = vpop.eup %444 }
 0x230   :  { %411 = vmatmul.mubr.msk.f32.vlgmr.msra.gmra.mrb[2].mxu0 %vm181_vm2, %v445_v33 }
 0x303   :  { %v341_v35 = vpop.f32.mrb[2].mxu0 }
 0x304   :  { %v342_v36 = vadd.f32 %v369_v34, %v341_v35  ;;  %v412_v37 = vpop.f32.mrb[3].mxu0 }
 0x306   :  { %345 = vst.msk [vmem:[#allocation10] sm:$0xff] %vm181_vm2, %v342_v36 }
 0x307   :  { %545 = shalt.err (!%p542_p8)
}
 0x308   :  { %s546_s9 = scalar_lea.hbm %s702_s7, 128 }
 0x309   :  { %p547_p9 = scmp.ne.s32.totalorder %s702_s7, %s546_s9  ;;  %p550_p10 = scmp.lt.u32.totalorder %s546_s9, %s702_s7 }
 0x30b   :  { %p552_p11 = pnand %p550_p10, %p547_p9 }
 0x30d   :  { %555 = shalt.err (!%p552_p11)
}
 0x30e   :  { %355 = dma.vmem_to_hbm [thread:$0]  %s353_s29, 128, %s702_s7, [#allocation4]  }
 0x30f   :  { %562 = dma.done.wait [#allocation4], 128  }
 0x310   :  { %563 = vsyncadd [#allocation4], 4294967168 }
 0x311   :  { %359 = vsyncpa [#allocation3], 1 }
 0x312   :  { %360 = vsyncpa [#allocation6], 1 }
 0x313   :  { %361 = vsyncpa [#allocation9], 1 }
 0x314   :  { %362 = vsyncpa [#allocation4], 1 }

</bundles_post_ra>
